<compile_context>
chip_gen: v6e
topology: v6e:2x2x1
jax: 0.10.0
libtpu: 0.0.40
codegen_flags: <defaults>
</compile_context>

<pallas_src>
import jax
import jax.numpy as jnp
from jax.experimental import pallas as pl
from jax.experimental.pallas import tpu as pltpu


def _round_up(x, m):
    return ((x + m - 1) // m) * m


def _cdiv(a, b):
    return (a + b - 1) // b


def mlp_kernel(x_ref, w_ref, b_ref, o_ref):
    """Computes one (tm, tn) output tile; K is the innermost grid axis.

    The output block index ignores k, so o_ref stays resident in VMEM across
    the whole K loop and doubles as the f32 accumulator (no scratch needed).
    """
    k = pl.program_id(2)

    @pl.when(k == 0)
    def _():
        o_ref[...] = jnp.zeros_like(o_ref)

    # MXU matmul, f32 accumulation (inputs may be f32 or bf16).
    o_ref[...] += jnp.dot(
        x_ref[...], w_ref[...], preferred_element_type=jnp.float32
    )

    @pl.when(k == pl.num_programs(2) - 1)
    def _():
        # Epilogue once per output tile: bias add + ReLU on the VPU.
        o_ref[...] = jnp.maximum(o_ref[...] + b_ref[...], 0.0)


def make_mlp(w, b, *, tm=512, tn=512, tk=512, input_dtype=None,
             vmem_limit_bytes=None):
    """Build a forward fn computing y = relu(x @ w + b).

    w: (D_in, D_out), b: (D_out,).  Weight/bias padding (only if unaligned)
    and the optional bf16 cast happen ONCE here, at parameter-setup time.
    input_dtype=jnp.bfloat16 feeds the bf16 MXU on v6e/v7x; accumulation and
    the output stay f32.
    """
    K, N = w.shape
    assert b.shape == (N,)
    out_dtype = jnp.float32
    w_dtype = input_dtype if input_dtype is not None else w.dtype

    # Pad K/N to lane granularity, clamp tiles, re-pad to tile multiples.
    Kp = _round_up(K, 128)
    Np = _round_up(N, 128)
    tk = min(tk, Kp)
    tn = min(tn, Np)
    Kp = _round_up(Kp, tk)
    Np = _round_up(Np, tn)

    if (Kp, Np) != (K, N):
        wp = jnp.zeros((Kp, Np), w_dtype).at[:K, :N].set(w.astype(w_dtype))
        bp = jnp.zeros((1, Np), jnp.float32).at[0, :N].set(
            b.astype(jnp.float32))
    else:
        wp = w.astype(w_dtype)
        bp = b.astype(jnp.float32).reshape(1, Np)

    def forward(x):
        M, Kx = x.shape
        assert Kx == K
        x_dtype = input_dtype if input_dtype is not None else x.dtype

        Mp = _round_up(M, 8)
        tm_ = min(tm, Mp)
        # v7x megacore: keep >= 2 blocks across the parallel (M, N) grid axes
        # when possible so both TensorCores get work.
        if (Mp // tm_) * (Np // tn) < 2 and Mp >= 16:
            tm_ = _round_up(_cdiv(Mp, 2), 8)
        Mp_ = _round_up(Mp, tm_)

        if (Mp_, Kp) != (M, K):
            xp = jnp.zeros((Mp_, Kp), x_dtype).at[:M, :K].set(
                x.astype(x_dtype))
        else:
            xp = x.astype(x_dtype)

        grid = (Mp_ // tm_, Np // tn, Kp // tk)

        out = pl.pallas_call(
            mlp_kernel,
            out_shape=jax.ShapeDtypeStruct((Mp_, Np), out_dtype),
            grid_spec=pltpu.PrefetchScalarGridSpec(
                num_scalar_prefetch=0,
                grid=grid,
                in_specs=[
                    pl.BlockSpec((tm_, tk), lambda i, j, k: (i, k)),
                    pl.BlockSpec((tk, tn), lambda i, j, k: (k, j)),
                    # Bias tile depends only on j -> resident across i / k.
                    pl.BlockSpec((1, tn), lambda i, j, k: (0, j)),
                ],
                out_specs=pl.BlockSpec((tm_, tn), lambda i, j, k: (i, j)),
            ),
            compiler_params=pltpu.CompilerParams(
                dimension_semantics=("parallel", "parallel", "arbitrary"),
                vmem_limit_bytes=vmem_limit_bytes,
            ),
        )(xp, wp, bp)

        if (Mp_, Np) != (M, N):
            out = out[:M, :N]
        return out

    return forward


def mlp_forward(x, w, b, **kwargs):
    """Convenience wrapper: y = relu(x @ w + b).  In a real model, call
    make_mlp(w, b, ...) once and reuse the returned forward fn."""
    return make_mlp(w, b, **kwargs)(x)


if __name__ == "__main__":
    key = jax.random.PRNGKey(0)

    def make_inputs(batch, d_in, d_out, k):
        kx, kw, kb = jax.random.split(k, 3)
        x = jax.random.normal(kx, (batch, d_in), dtype=jnp.float32)
        w = jax.random.normal(kw, (d_in, d_out), dtype=jnp.float32) / jnp.sqrt(
            jnp.float32(d_in))
        b = jax.random.normal(kb, (d_out,), dtype=jnp.float32) * 0.01
        ref = jnp.maximum(
            jnp.dot(x, w, precision=jax.lax.Precision.HIGHEST) + b, 0.0)
        return x, w, b, ref

    k1, k2, k3 = jax.random.split(key, 3)

    # 1) f32, multi-tile: exercises the megacore split (grid (2, 1, 1)) and
    #    the pipelined accumulate-into-output path.
    x, w, b, ref = make_inputs(256, 256, 384, k1)
    out = jax.block_until_ready(mlp_forward(x, w, b))
    assert out.shape == ref.shape
    assert jnp.allclose(out, ref, atol=1e-4, rtol=1e-4), float(
        jnp.max(jnp.abs(out - ref)))

    # 2) f32, small & unaligned (spec-sized MLP): exercises the padding path.
    x, w, b, ref = make_inputs(8, 32, 32, k2)
    out = jax.block_until_ready(mlp_forward(x, w, b))
    assert out.shape == ref.shape
    assert jnp.allclose(out, ref, atol=1e-4, rtol=1e-4), float(
        jnp.max(jnp.abs(out - ref)))

    # 3) bf16 inputs (v6e/v7x MXU path), f32 accumulation, aligned shapes:
    #    exercises the no-padding / cast-only path. Looser tolerance (input
    #    cast to bf16).
    x, w, b, ref = make_inputs(256, 512, 512, k3)
    fwd = make_mlp(w, b, input_dtype=jnp.bfloat16)   # pad/cast once at setup
    out = jax.block_until_ready(fwd(x))
    assert out.shape == ref.shape
    assert jnp.allclose(out, ref, atol=1e-1, rtol=1e-1), float(
        jnp.max(jnp.abs(out - ref)))

    print("KERNEL_OK")
</pallas_src>

<mosaic_0001>
module attributes {stable_mosaic.version = 11 : i64} {
  func.func @mlp_kernel(%arg0: i32, %arg1: i32, %arg2: i32, %arg3: memref<128x256xf32, #tpu.memory_space<vmem>>, %arg4: memref<256x384xf32, #tpu.memory_space<vmem>>, %arg5: memref<1x384xf32, #tpu.memory_space<vmem>>, %arg6: memref<128x384xf32, #tpu.memory_space<vmem>>) attributes {dimension_semantics = [#tpu.dimension_semantics<parallel>, #tpu.dimension_semantics<parallel>, #tpu.dimension_semantics<arbitrary>], iteration_bounds = array<i64: 2, 1, 1>, scalar_prefetch = 0 : i64, scratch_operands = 0 : i64, tpu.core_type = #tpu.core_type<tc>, window_params = [{transform_indices = @transform_0, window_bounds = array<i64: 128, 256>}, {transform_indices = @transform_1, window_bounds = array<i64: 256, 384>}, {transform_indices = @transform_2, window_bounds = array<i64: 1, 384>}, {transform_indices = @transform_3, window_bounds = array<i64: 128, 384>}]} {
    %c0_i32 = arith.constant 0 : i32
    %0 = arith.cmpi eq, %arg2, %c0_i32 : i32
    %1 = arith.extui %0 : i1 to i32
    %c0_i32_0 = arith.constant 0 : i32
    %2 = arith.cmpi ne, %1, %c0_i32_0 : i32
    scf.if %2 {
      %cst_10 = arith.constant 0.000000e+00 : f32
      %12 = vector.broadcast %cst_10 : f32 to vector<128x384xf32>
      %c0_11 = arith.constant 0 : index
      %c0_12 = arith.constant 0 : index
      %13 = vector.load %arg6[%c0_11, %c0_12] : memref<128x384xf32, #tpu.memory_space<vmem>>, vector<128x384xf32>
      tpu.vector_store %arg6[%c0_11, %c0_12], %12 {strides = array<i32>} : memref<128x384xf32, #tpu.memory_space<vmem>>, vector<128x384xf32>,
    } else {
    }
    %c0 = arith.constant 0 : index
    %c0_1 = arith.constant 0 : index
    %3 = vector.load %arg6[%c0, %c0_1] : memref<128x384xf32, #tpu.memory_space<vmem>>, vector<128x384xf32>
    %c0_2 = arith.constant 0 : index
    %c0_3 = arith.constant 0 : index
    %4 = vector.load %arg3[%c0_2, %c0_3] : memref<128x256xf32, #tpu.memory_space<vmem>>, vector<128x256xf32>
    %c0_4 = arith.constant 0 : index
    %c0_5 = arith.constant 0 : index
    %5 = vector.load %arg4[%c0_4, %c0_5] : memref<256x384xf32, #tpu.memory_space<vmem>>, vector<256x384xf32>
    %cst = arith.constant dense<0.000000e+00> : vector<128x384xf32>
    %6 = tpu.matmul %4, %5, %cst {dimension_numbers = #tpu.dot_dimension_numbers<[1], [0], [0], [1], [0, 0, 1, 1], [], []>} : vector<128x256xf32>, vector<256x384xf32>, vector<128x384xf32> -> vector<128x384xf32>
    %7 = arith.addf %3, %6 : vector<128x384xf32>
    %c0_6 = arith.constant 0 : index
    %c0_7 = arith.constant 0 : index
    %8 = vector.load %arg6[%c0_6, %c0_7] : memref<128x384xf32, #tpu.memory_space<vmem>>, vector<128x384xf32>
    tpu.vector_store %arg6[%c0_6, %c0_7], %7 {strides = array<i32>} : memref<128x384xf32, #tpu.memory_space<vmem>>, vector<128x384xf32>,
    %c0_i32_8 = arith.constant 0 : i32
    %9 = arith.cmpi eq, %arg2, %c0_i32_8 : i32
    %10 = arith.extui %9 : i1 to i32
    %c0_i32_9 = arith.constant 0 : i32
    %11 = arith.cmpi ne, %10, %c0_i32_9 : i32
    scf.if %11 {
      %c0_10 = arith.constant 0 : index
      %c0_11 = arith.constant 0 : index
      %12 = vector.load %arg6[%c0_10, %c0_11] : memref<128x384xf32, #tpu.memory_space<vmem>>, vector<128x384xf32>
      %c0_12 = arith.constant 0 : index
      %c0_13 = arith.constant 0 : index
      %13 = vector.load %arg5[%c0_12, %c0_13] : memref<1x384xf32, #tpu.memory_space<vmem>>, vector<1x384xf32>
      %14 = vector.broadcast %13 : vector<1x384xf32> to vector<128x384xf32>
      %15 = arith.addf %12, %14 : vector<128x384xf32>
      %cst_14 = arith.constant 0.000000e+00 : f32
      %16 = vector.broadcast %cst_14 : f32 to vector<128x384xf32>
      %17 = arith.maximumf %15, %16 : vector<128x384xf32>
      %c0_15 = arith.constant 0 : index
      %c0_16 = arith.constant 0 : index
      %18 = vector.load %arg6[%c0_15, %c0_16] : memref<128x384xf32, #tpu.memory_space<vmem>>, vector<128x384xf32>
      tpu.vector_store %arg6[%c0_15, %c0_16], %17 {strides = array<i32>} : memref<128x384xf32, #tpu.memory_space<vmem>>, vector<128x384xf32>,
    } else {
    }
    return
  }
  func.func @transform_0(%arg0: i32, %arg1: i32, %arg2: i32) -> (i32, i32) {
    %c0_i32 = arith.constant 0 : i32
    return %arg0, %arg2 : i32, i32
  }
  func.func @transform_1(%arg0: i32, %arg1: i32, %arg2: i32) -> (i32, i32) {
    %c0_i32 = arith.constant 0 : i32
    return %arg2, %arg1 : i32, i32
  }
  func.func @transform_2(%arg0: i32, %arg1: i32, %arg2: i32) -> (i32, i32) {
    %c0_i32 = arith.constant 0 : i32
    %c0_i32_0 = arith.constant 0 : i32
    return %c0_i32, %arg1 : i32, i32
  }
  func.func @transform_3(%arg0: i32, %arg1: i32, %arg2: i32) -> (i32, i32) {
    %c0_i32 = arith.constant 0 : i32
    return %arg0, %arg1 : i32, i32
  }
}

</mosaic_0001>

<bundles_post_ra>
// kernel: tpu_custom_call.1
= control target key start
LH: loop header
LB: loop body
LE: loop exit
PB: predicated region body
PF: predicated region fallthrough
CT: control target
= control target key end

     0   :  { %8 = vsyncpa [#allocation3], 0  ;;  %s1931_s0 = inlined_call_operand.hbm [shape: f32[256,256], index: 0, kind: input, shape index: {}]   ;;  %s1932_s1 = inlined_call_operand.hbm [shape: f32[256,384], index: 1, kind: input, shape index: {}]   ;;  %s1933_s2 = inlined_call_operand.vmem [shape: f32[1,384], index: 2, kind: input, shape index: {}]   ;;  %s1934_s3 = inlined_call_operand.hbm [shape: f32[256,384], index: 3, kind: output, shape index: {}]  }
   0x1   :  { %10 = vsyncpa [#allocation3 + $0x1], 0 }
   0x2   :  { %11 = vsyncpa [#allocation6], 0 }
   0x3   :  { %12 = vsyncpa [#allocation4], 0 }
   0x4   :  { %14 = vsyncpa [#allocation4 + $0x1], 0  ;;  %s1595_s12 = smov 0   ;;  %s1597_s13 = smov 0  }
   0x5   :  { %s1599_s14 = smov 0   ;;  %s1601_s15 = smov 0  }
   0x6   :  { %s1603_s16 = smov 0   ;;  %s1605_s17 = smov 0  }
   0x7 LB: > { %s1244_s18 = sadd.s32 4294967295, %s1564_s17   ;;  %s1245_s19 = sadd.s32 4294967294, %s1564_s17   ;;  %s1564_s17 = sphi %s1605_s17, %s20_s17   ;;  %s1560_s16 = sphi %s1603_s16, %s1952_s16   ;;  %s1556_s15 = sphi %s1601_s15, %s1951_s15   ;;  %s1552_s14 = sphi %s1599_s14, %s1950_s14   ;;  %s1548_s13 = sphi %s1597_s13, %s1949_s13   ;;  %s1544_s12 = sphi %s1595_s12, %s1948_s12  }
   0x8   : > { %p61_p0 = scmp.ne.s32.totalorder %s1548_s13, %s1544_s12  ;;  %p1629_p1 = scmp.eq.s32.totalorder %s1244_s18, 0 }
   0x9   : > { %p1633_p2 = scmp.eq.s32.totalorder %s1244_s18, 1  ;;  %p147_p3 = scmp.eq.s32.totalorder %s1245_s19, 1 }
   0xa   : > { %p1639_p4 = por %p1629_p1, %p61_p0  ;;  %p1246_p5 = scmp.ge.s32.totalorder %s1564_s17, 1 }
   0xb   : > { %p1644_p6 = por %p147_p3, %p61_p0  ;;  %p154_p7 = scmp.lt.s32.totalorder %s1564_s17, 3 }
   0xc   : > { %s1938_s22 = scalar_select %p1639_p4, 1, 0 }
   0xd   : > { %s1939_s23 = scalar_select %p1644_p6, 1, 0 }
   0xe   : > { %p1649_p8 = pnand %p1246_p5, %p154_p7  ;;  %s1566_s25 = smov [#allocation5]  }
   0xf   : > { %s172_s26 = sshll.u32 %s1566_s25, 4  ;;  %s39_s28 = sadd.s32 1, %s1560_s16  ;;  %s173_s26 = int_to_ptr.vmem [resolvable:$true] %s172_s26 }
  0x10   : > { %p1354_p9 = pneg %p1649_p8  ;;  %s1437_s29 = scalar_lea.vmem %s173_s26, 12288 }
  0x11   : > { %p1438_p13 = scmp.ne.s32.totalorder %s173_s26, %s1437_s29  ;;  %p1445_p5 = scmp.lt.s32.totalorder %s173_s26, %s173_s26 }
  0x12   : > { %p1658_p11 = pnand %p1354_p9, %p1629_p1  ;;  %p1446_p7 = scmp.lt.s32.totalorder %s1437_s29, %s1437_s29 }
  0x14   : > { %p1428_p12 = pneg %p1658_p11  ;;  %p1447_p6 = por %p1446_p7, %p1445_p5 }
  0x16   : > { %p1440_p0 = pnand %p1438_p13, %p1428_p12 }
  0x18   : > { %p1441_p3 = pneg %p1440_p0 }
  0x1a   : > { %p1448_p4 = pnand %p1447_p6, %p1441_p3 }
  0x1c   : > { %1451 = shalt.err (!%p1448_p4)
}
  0x1d   : > { %s1567_s30 = smov 384   ;;  %s1568_s4 = smov 24  }
  0x1e   : > { %1357 = dma.hbm_to_vmem [thread:$0]  (!%p1658_p11), %s1932_s1, 12288, %s173_s26, [#allocation6], %s1567_s30, %s1567_s30, %s1568_s4  }
  0x1f   : > { %p41_p6 = scmp.ge.s32.totalorder %s39_s28, 2  ;;  %s48_s7 = sadd.s32 1, %s1552_s14 }
  0x20   : > { %p55_p4 = scmp.ne.s32.totalorder %s1552_s14, %s1548_s13  ;;  %p56_p9 = scmp.eq.s32.totalorder %s1564_s17, 0 }
  0x21   : > { %s1954_s28 = smov (%p41_p6, %s39_s28), 0  ;;  %p1367_p0 = scmp.lt.s32.totalorder %s1564_s17, 2 }
  0x22   : > { %p1676_p12 = por %p56_p9, %p55_p4  ;;  %p1682_p13 = por %p1633_p2, %p55_p4 }
  0x23   : > { %s43_s10 = ssub.s32 %s1560_s16, %s1954_s28  ;;  %s194_s11 = sand.u32 1, %s1552_s14  }
  0x24   : > { %p46_p11 = scmp.eq.s32.totalorder %s43_s10, 0  ;;  %s1250_s18 = sshll.u32 %s194_s11, 8 }
  0x25   : > { %s1263_s25 = sshll.u32 %s1560_s16, 12  ;;  %s198_s30 = scalar_lea.vmem [#allocation2], %s1250_s18 }
  0x26   : > { %s1691_s19 = scalar_select %p46_p11, %s1552_s14, %s48_s7  }
  0x27   : > { %s207_s29 = scalar_lea.hbm %s1931_s0, %s1263_s25  ;;  %s208_s4 = sshll.u32 %s198_s30, 4  ;;  %s209_s4 = int_to_ptr.vmem [resolvable:$true] %s208_s4 }
  0x28   : > { %p1699_p2 = pnand %p1367_p0, %p1676_p12  ;;  %s195_s5 = scalar_lea.sflag [#allocation3], %s194_s11 }
  0x29   : > { %s1465_s6 = scalar_lea.vmem %s209_s4, 4096  ;;  %s1569_s7 = smov [#allocation2]  }
  0x2a   : > { %p1454_p3 = pneg %p1699_p2  ;;  %p1466_p5 = scmp.ne.s32.totalorder %s209_s4, %s1465_s6 }
  0x2b   : > { %s1470_s10 = sshll.u32 %s1569_s7, 4  ;;  %s1471_s10 = int_to_ptr.vmem [resolvable:$false] %s1470_s10 }
  0x2c   : > { %p1468_p7 = pnand %p1466_p5, %p1454_p3  ;;  %s1472_s25 = scalar_lea.vmem %s1471_s10, 8192 }
  0x2d   : > { %p1473_p4 = scmp.lt.s32.totalorder %s209_s4, %s1471_s10  ;;  %p1474_p9 = scmp.lt.s32.totalorder %s1472_s25, %s1465_s6 }
  0x2e   : > { %p1469_p6 = pneg %p1468_p7 }
  0x2f   : > { %p1475_p11 = por %p1474_p9, %p1473_p4 }
  0x31   : > { %p1476_p10 = pnand %p1475_p11, %p1469_p6 }
  0x33   : > { %1479 = shalt.err (!%p1476_p10)
}
  0x34   : > { %s1570_s8 = smov 256   ;;  %s1571_s18 = smov 16  }
  0x35   : > { %1361 = dma.hbm_to_vmem [thread:$0]  (!%p1699_p2), %s207_s29, 4096, %s209_s4, %s195_s5, %s1570_s8, %s1570_s8, %s1571_s18  }
  0x36   : > { %220 = sbr.rel (%p1649_p8) target bundleno = 400 (0x190), region = 32  ;;  %s1710_s11 = sand.u32 (!%p1649_p8), 1, %s1548_s13  }
  0x37   : > { %s1255_s26 = sshll.u32 (!%p1649_p8), %s1710_s11, 8  ;;  %s223_s27 = scalar_lea.sflag (!%p1649_p8), [#allocation3], %s1710_s11 }
  0x38   : > { %s1714_s30 = scalar_lea.vmem (!%p1649_p8), [#allocation2], %s1255_s26  ;;  %p1945_p12 = scmp.ne.s32.totalorder (!%p1649_p8), %s1938_s22, 0 }
  0x3b   : > { %1531 = dma.done.wait (%p1945_p12), %s223_s27, 4096  }
  0x3c   : > { %1533 = vsyncadd (%p1945_p12), %s223_s27, 4294963200 }
  0x3d   : > { %1535 = dma.done.wait (%p1629_p1), [#allocation6], 12288  }
  0x3e   : > { %1537 = vsyncadd (%p1629_p1), [#allocation6], 4294955008  ;;  %v446_v0 = vld [vmem:[#allocation5 + $0x170] sm:$0xff]  ;;  %v445_v1 = vld [vmem:[#allocation5 + $0x168] sm:$0xff]  ;;  %s1344_s24 = smul.u32 384, %s1710_s11  ;;  %s1572_s25 = smov [#allocation7]  }
  0x3f   : > { %v443_v2 = vld [vmem:[#allocation5 + $0x158] sm:$0xff]  ;;  %496 = vmatprep.subr.mxu0 %v446_v0  ;;  %v442_v3 = vld [vmem:[#allocation5 + $0x150] sm:$0xff]  ;;  %v440_v4 = vld [vmem:[#allocation5 + $0x140] sm:$0xff]  ;;  %s1345_s4 = smul.u32 6144, %s1556_s15  ;;  %s1111_s15 = scalar_lea.sflag [#allocation4], %s1710_s11 }
  0x40   : > { %497 = vmatpush1.msra.mxu0 %v445_v1  ;;  %v439_v5 = vld [vmem:[#allocation5 + $0x138] sm:$0xff]  ;;  %v437_v6 = vld [vmem:[#allocation5 + $0x128] sm:$0xff]  ;;  %v436_v7 = vld [vmem:[#allocation5 + $0x120] sm:$0xff]  ;;  %s1775_s29 = scalar_lea.vmem [#allocation7], %s1344_s24  ;;  %s1484_s8 = sshll.u32 %s1572_s25, 4  ;;  %s1485_s8 = int_to_ptr.vmem [resolvable:$false] %s1484_s8 }
  0x41   : > { %498 = vmatprep.subr.mxu0 %v443_v2  ;;  %v434_v8 = vld [vmem:[#allocation5 + $0x110] sm:$0xff]  ;;  %v433_v9 = vld [vmem:[#allocation5 + $0x108] sm:$0xff]  ;;  %v431_v10 = vld [vmem:[#allocation5 + $0xf8] sm:$0xff]  ;;  %s1127_s21 = sshll.u32 %s1775_s29, 4  ;;  %s1879_s7 = scalar_lea.hbm %s1934_s3, %s1345_s4  ;;  %s1881_s21 = int_to_ptr.vmem [resolvable:$true] %s1127_s21 }
  0x42   : > { %499 = vmatpush1.msra.mxu0 %v442_v3  ;;  %v430_v11 = vld [vmem:[#allocation5 + $0xf0] sm:$0xff]  ;;  %v495_v12 = vld [vmem:[#allocation5 + $0x2f8] sm:$0xff]  ;;  %v428_v13 = vld [vmem:[#allocation5 + $0xe0] sm:$0xff]  ;;  %s1480_s10 = scalar_lea.vmem %s1881_s21, 6144  ;;  %s1486_s18 = scalar_lea.vmem %s1485_s8, 12288 }
  0x43   : > { %500 = vmatprep.subr.mxu0 %v440_v4  ;;  %1264 = vmatprep.subr.mxu1 %v495_v12  ;;  %v447_v14 = vld [vmem:[#allocation5 + $0x178] sm:$0xff]  ;;  %v492_v16 = vld [vmem:[#allocation5 + $0x2e0] sm:$0xff]  ;;  %v425_v18 = vld [vmem:[#allocation5 + $0xc8] sm:$0xff]  ;;  %p1481_p1 = scmp.ne.s32.totalorder %s1881_s21, %s1480_s10  ;;  %p1487_p0 = scmp.lt.s32.totalorder %s1881_s21, %s1485_s8 }
  0x44   : > { %501 = vmatpush1.msra.mxu0 %v439_v5  ;;  %v427_v15 = vld [vmem:[#allocation5 + $0xd8] sm:$0xff]  ;;  %1265 = vmatpush3.msra.mxu1 %v447_v14  ;;  %v444_v17 = vld [vmem:[#allocation5 + $0x160] sm:$0xff]  ;;  %v489_v19 = vld [vmem:[#allocation5 + $0x2c8] sm:$0xff]  ;;  %p1488_p2 = scmp.lt.s32.totalorder %s1486_s18, %s1480_s10 }
  0x45   : > { %502 = vmatprep.subr.mxu0 %v437_v6  ;;  %1266 = vmatprep.subr.mxu1 %v492_v16  ;;  %v424_v20 = vld [vmem:[#allocation5 + $0xc0] sm:$0xff]  ;;  %v441_v21 = vld [vmem:[#allocation5 + $0x148] sm:$0xff]  ;;  %v486_v22 = vld [vmem:[#allocation5 + $0x2b0] sm:$0xff]  ;;  %p1482_p8 = pnand %p1481_p1, %p1682_p13 }
  0x46   : > { %503 = vmatpush1.msra.mxu0 %v436_v7  ;;  %1267 = vmatpush3.msra.mxu1 %v444_v17  ;;  %v422_v23 = vld [vmem:[#allocation5 + $0xb0] sm:$0xff]  ;;  %v421_v25 = vld [vmem:[#allocation5 + $0xa8] sm:$0xff]  ;;  %v483_v26 = vld [vmem:[#allocation5 + $0x298] sm:$0xff]  ;;  %p1489_p3 = por %p1488_p2, %p1487_p0 }
  0x47   : > { %504 = vmatprep.subr.mxu0 %v434_v8  ;;  %1268 = vmatprep.subr.mxu1 %v489_v19  ;;  %v438_v24 = vld [vmem:[#allocation5 + $0x130] sm:$0xff]  ;;  %v419_v27 = vld [vmem:[#allocation5 + $0x98] sm:$0xff]  ;;  %v480_v30 = vld [vmem:[#allocation5 + $0x280] sm:$0xff]  ;;  %p1483_p10 = pneg %p1482_p8 }
  0x48   : > { %505 = vmatpush1.msra.mxu0 %v433_v9  ;;  %1269 = vmatpush3.msra.mxu1 %v441_v21  ;;  %v435_v28 = vld [vmem:[#allocation5 + $0x118] sm:$0xff]  ;;  %v418_v29 = vld [vmem:[#allocation5 + $0x90] sm:$0xff]  ;;  %v416_v31 = vld [vmem:[#allocation5 + $0x80] sm:$0xff] }
  0x49   : > { %506 = vmatprep.subr.mxu0 %v431_v10  ;;  %1270 = vmatprep.subr.mxu1 %v486_v22  ;;  %v432_v32 = vld [vmem:[#allocation5 + $0x100] sm:$0xff]  ;;  %v415_v33 = vld [vmem:[#allocation5 + $0x78] sm:$0xff]  ;;  %v477_v34 = vld [vmem:[#allocation5 + $0x268] sm:$0xff]  ;;  %p1490_p5 = pnand %p1489_p3, %p1483_p10 }
  0x4a   : > { %507 = vmatpush1.msra.mxu0 %v430_v11  ;;  %1271 = vmatpush3.msra.mxu1 %v438_v24  ;;  %v413_v35 = vld [vmem:[#allocation5 + $0x68] sm:$0xff]  ;;  %v412_v37 = vld [vmem:[#allocation5 + $0x60] sm:$0xff]  ;;  %v474_v38 = vld [vmem:[#allocation5 + $0x250] sm:$0xff] }
  0x4b   : > { %508 = vmatprep.subr.mxu0 %v428_v13  ;;  %1272 = vmatprep.subr.mxu1 %v483_v26  ;;  %v429_v36 = vld [vmem:[#allocation5 + $0xe8] sm:$0xff]  ;;  %v410_v39 = vld [vmem:[#allocation5 + $0x50] sm:$0xff]  ;;  %v471_v42 = vld [vmem:[#allocation5 + $0x238] sm:$0xff] }
  0x4c   : > { %509 = vmatpush1.msra.mxu0 %v427_v15  ;;  %1273 = vmatpush3.msra.mxu1 %v435_v28  ;;  %v426_v40 = vld [vmem:[#allocation5 + $0xd0] sm:$0xff]  ;;  %v409_v41 = vld [vmem:[#allocation5 + $0x48] sm:$0xff]  ;;  %v407_v43 = vld [vmem:[#allocation5 + $0x38] sm:$0xff] }
  0x4d   : > { %510 = vmatprep.subr.mxu0 %v425_v18  ;;  %1274 = vmatprep.subr.mxu1 %v480_v30  ;;  %v423_v44 = vld [vmem:[#allocation5 + $0xb8] sm:$0xff]  ;;  %v406_v45 = vld [vmem:[#allocation5 + $0x30] sm:$0xff]  ;;  %v468_v46 = vld [vmem:[#allocation5 + $0x220] sm:$0xff] }
  0x4e   : > { %511 = vmatpush1.msra.mxu0 %v424_v20  ;;  %1275 = vmatpush3.msra.mxu1 %v432_v32  ;;  %v404_v47 = vld [vmem:[#allocation5 + $0x20] sm:$0xff]  ;;  %v403_v49 = vld [vmem:[#allocation5 + $0x18] sm:$0xff]  ;;  %v465_v50 = vld [vmem:[#allocation5 + $0x208] sm:$0xff] }
  0x4f   : > { %512 = vmatprep.subr.mxu0 %v422_v23  ;;  %1276 = vmatprep.subr.mxu1 %v477_v34  ;;  %v420_v48 = vld [vmem:[#allocation5 + $0xa0] sm:$0xff]  ;;  %v401_v51 = vld [vmem:[#allocation5 + $0x8] sm:$0xff]  ;;  %v462_v54 = vld [vmem:[#allocation5 + $0x1f0] sm:$0xff] }
  0x50   : > { %513 = vmatpush1.msra.mxu0 %v421_v25  ;;  %1277 = vmatpush3.msra.mxu1 %v429_v36  ;;  %v417_v52 = vld [vmem:[#allocation5 + $0x88] sm:$0xff]  ;;  %v400_v53 = vld [vmem:[#allocation5] sm:$0xff]  ;;  %v494_v55 = vld [vmem:[#allocation5 + $0x2f0] sm:$0xff] }
  0x51   : > { %514 = vmatprep.subr.mxu0 %v419_v27  ;;  %1278 = vmatprep.subr.mxu1 %v474_v38  ;;  %v414_v56 = vld [vmem:[#allocation5 + $0x70] sm:$0xff]  ;;  %v493_v57 = vld [vmem:[#allocation5 + $0x2e8] sm:$0xff]  ;;  %v459_v58 = vld [vmem:[#allocation5 + $0x1d8] sm:$0xff] }
  0x52   : > { %515 = vmatpush1.msra.mxu0 %v418_v29  ;;  %1279 = vmatpush3.msra.mxu1 %v426_v40  ;;  %v491_v59 = vld [vmem:[#allocation5 + $0x2d8] sm:$0xff]  ;;  %v490_v61 = vld [vmem:[#allocation5 + $0x2d0] sm:$0xff]  ;;  %v456_v62 = vld [vmem:[#allocation5 + $0x1c0] sm:$0xff] }
  0x53   : > { %516 = vmatprep.subr.mxu0 %v416_v31  ;;  %1280 = vmatprep.subr.mxu1 %v471_v42  ;;  %v411_v60 = vld [vmem:[#allocation5 + $0x58] sm:$0xff]  ;;  %v488_v63 = vld [vmem:[#allocation5 + $0x2c0] sm:$0xff]  ;;  %v453_v2 = vld [vmem:[#allocation5 + $0x1a8] sm:$0xff] }
  0x54   : > { %517 = vmatpush1.msra.mxu0 %v415_v33  ;;  %1281 = vmatpush3.msra.mxu1 %v423_v44  ;;  %v408_v0 = vld [vmem:[#allocation5 + $0x40] sm:$0xff]  ;;  %v487_v1 = vld [vmem:[#allocation5 + $0x2b8] sm:$0xff]  ;;  %v485_v3 = vld [vmem:[#allocation5 + $0x2a8] sm:$0xff] }
  0x55   : > { %518 = vmatprep.subr.mxu0 %v413_v35  ;;  %1282 = vmatprep.subr.mxu1 %v468_v46  ;;  %v405_v4 = vld [vmem:[#allocation5 + $0x28] sm:$0xff]  ;;  %v484_v5 = vld [vmem:[#allocation5 + $0x2a0] sm:$0xff]  ;;  %v450_v6 = vld [vmem:[#allocation5 + $0x190] sm:$0xff] }
  0x56   : > { %519 = vmatpush1.msra.mxu0 %v412_v37  ;;  %1283 = vmatpush3.msra.mxu1 %v420_v48  ;;  %v482_v7 = vld [vmem:[#allocation5 + $0x290] sm:$0xff]  ;;  %v481_v9 = vld [vmem:[#allocation5 + $0x288] sm:$0xff]  ;;  %v479_v11 = vld [vmem:[#allocation5 + $0x278] sm:$0xff] }
  0x57   : > { %520 = vmatprep.subr.mxu0 %v410_v39  ;;  %1284 = vmatprep.subr.mxu1 %v465_v50  ;;  %v402_v8 = vld [vmem:[#allocation5 + $0x10] sm:$0xff]  ;;  %v369_v10 = vld [vmem:[%s1714_s30 + $0x8] sm:$0xff]  ;;  %v1726_v12 = vld [vmem:[%s1714_s30] sm:$0xff] }
  0x58   : > { %521 = vmatpush1.msra.mxu0 %v409_v41  ;;  %1285 = vmatpush3.msra.mxu1 %v417_v52  ;;  %v478_v13 = vld [vmem:[#allocation5 + $0x270] sm:$0xff]  ;;  %v476_v14 = vld [vmem:[#allocation5 + $0x260] sm:$0xff]  ;;  %v1729_v15 = vld [vmem:[%s1714_s30 + $0x18] sm:$0xff] }
  0x59   : > { %522 = vmatprep.subr.mxu0 %v407_v43  ;;  %1286 = vmatprep.subr.mxu1 %v462_v54  ;;  %v475_v16 = vld [vmem:[#allocation5 + $0x258] sm:$0xff]  ;;  %v473_v17 = vld [vmem:[#allocation5 + $0x248] sm:$0xff]  ;;  %v1733_v18 = vld [vmem:[%s1714_s30 + $0x10] sm:$0xff] }
  0x5a   : > { %523 = vmatpush1.msra.mxu0 %v406_v45  ;;  %1287 = vmatpush3.msra.mxu1 %v414_v56  ;;  %v472_v19 = vld [vmem:[#allocation5 + $0x240] sm:$0xff]  ;;  %v373_v20 = vld [vmem:[%s1714_s30 + $0x28] sm:$0xff]  ;;  %v470_v21 = vld [vmem:[#allocation5 + $0x230] sm:$0xff] }
  0x5b   : > { %524 = vmatprep.subr.mxu0 %v404_v47  ;;  %1288 = vmatprep.subr.mxu1 %v459_v58  ;;  %v469_v22 = vld [vmem:[#allocation5 + $0x228] sm:$0xff]  ;;  %v467_v23 = vld [vmem:[#allocation5 + $0x218] sm:$0xff]  ;;  %v372_v24 = vld [vmem:[%s1714_s30 + $0x20] sm:$0xff] }
  0x5c   : > { %525 = vmatpush1.msra.mxu0 %v403_v49  ;;  %1289 = vmatpush3.msra.mxu1 %v411_v60  ;;  %v466_v25 = vld [vmem:[#allocation5 + $0x210] sm:$0xff]  ;;  %v375_v26 = vld [vmem:[%s1714_s30 + $0x38] sm:$0xff]  ;;  %v464_v27 = vld [vmem:[#allocation5 + $0x200] sm:$0xff] }
  0x5d   : > { %526 = vmatprep.subr.mxu0 %v401_v51  ;;  %1290 = vmatprep.subr.mxu1 %v456_v62  ;;  %v463_v28 = vld [vmem:[#allocation5 + $0x1f8] sm:$0xff]  ;;  %v461_v29 = vld [vmem:[#allocation5 + $0x1e8] sm:$0xff]  ;;  %v374_v30 = vld [vmem:[%s1714_s30 + $0x30] sm:$0xff] }
  0x5e   : > { %527 = vmatpush1.msra.mxu0 %v400_v53  ;;  %1291 = vmatpush3.msra.mxu1 %v408_v0  ;;  %v460_v31 = vld [vmem:[#allocation5 + $0x1e0] sm:$0xff]  ;;  %v377_v32 = vld [vmem:[%s1714_s30 + $0x48] sm:$0xff]  ;;  %v458_v33 = vld [vmem:[#allocation5 + $0x1d0] sm:$0xff]  ;;  %v951_v0 = vlaneseq }
  0x5f   : > { %528 = vmatprep.subr.mxu0 %v494_v55  ;;  %1292 = vmatprep.subr.mxu1 %v453_v2  ;;  %v457_v34 = vld [vmem:[#allocation5 + $0x1c8] sm:$0xff]  ;;  %v455_v35 = vld [vmem:[#allocation5 + $0x1b8] sm:$0xff]  ;;  %v376_v36 = vld [vmem:[%s1714_s30 + $0x40] sm:$0xff] }
  0x60   : > { %529 = vmatpush2.msra.mxu0 %v493_v57  ;;  %1293 = vmatpush3.msra.mxu1 %v405_v4  ;;  %v454_v37 = vld [vmem:[#allocation5 + $0x1b0] sm:$0xff]  ;;  %v379_v38 = vld [vmem:[%s1714_s30 + $0x58] sm:$0xff]  ;;  %v452_v39 = vld [vmem:[#allocation5 + $0x1a0] sm:$0xff] }
  0x61   : > { %530 = vmatprep.subr.mxu0 %v491_v59  ;;  %1294 = vmatprep.subr.mxu1 %v450_v6  ;;  %v451_v40 = vld [vmem:[#allocation5 + $0x198] sm:$0xff]  ;;  %v449_v41 = vld [vmem:[#allocation5 + $0x188] sm:$0xff]  ;;  %v378_v42 = vld [vmem:[%s1714_s30 + $0x50] sm:$0xff] }
  0x62   : > { %531 = vmatpush2.msra.mxu0 %v490_v61  ;;  %1295 = vmatpush3.msra.mxu1 %v402_v8  ;;  %v448_v43 = vld [vmem:[#allocation5 + $0x180] sm:$0xff]  ;;  %v381_v44 = vld [vmem:[%s1714_s30 + $0x68] sm:$0xff]  ;;  %v383_v46 = vld [vmem:[%s1714_s30 + $0x78] sm:$0xff] }
  0x63   : > { %532 = vmatprep.subr.mxu0 %v488_v63  ;;  %721 = vmatprep.mubr.f32.mxu1 %v369_v10  ;;  %v380_v45 = vld [vmem:[%s1714_s30 + $0x60] sm:$0xff]  ;;  %v382_v47 = vld [vmem:[%s1714_s30 + $0x70] sm:$0xff]  ;;  %v385_v48 = vld [vmem:[%s1714_s30 + $0x88] sm:$0xff] }
  0x64   : > { %533 = vmatpush2.msra.mxu0 %v487_v1  ;;  %722 = vmatmul.mubr.f32.vlgmr.msra.gmra.mxu1 %v1726_v12  ;;  %v384_v49 = vld [vmem:[%s1714_s30 + $0x80] sm:$0xff]  ;;  %v387_v50 = vld [vmem:[%s1714_s30 + $0x98] sm:$0xff]  ;;  %v386_v51 = vld [vmem:[%s1714_s30 + $0x90] sm:$0xff]  ;;  %v952_v1 = vshrl.u32 %v951_v0, 7 }
  0x65   : > { %534 = vmatprep.subr.mxu0 %v485_v3  ;;  %560 = vmatprep.mubr.f32.mxu0 %v369_v10  ;;  %v389_v52 = vld [vmem:[%s1714_s30 + $0xa8] sm:$0xff]  ;;  %v388_v53 = vld [vmem:[%s1714_s30 + $0xa0] sm:$0xff]  ;;  %v391_v54 = vld [vmem:[%s1714_s30 + $0xb8] sm:$0xff] }
  0x66   : > { %535 = vmatpush2.msra.mxu0 %v484_v5  ;;  %726 = vmatprep.mubr.f32.mxu1 %v1729_v15  ;;  %v390_v55 = vld [vmem:[%s1714_s30 + $0xb0] sm:$0xff]  ;;  %v393_v56 = vld [vmem:[%s1714_s30 + $0xc8] sm:$0xff]  ;;  %v392_v57 = vld [vmem:[%s1714_s30 + $0xc0] sm:$0xff]  ;;  %v961_v2 = vsub.s32 2, %v952_v1 }
  0x67   : > { %536 = vmatprep.subr.mxu0 %v482_v7  ;;  %v395_v58 = vld [vmem:[%s1714_s30 + $0xd8] sm:$0xff]  ;;  %v394_v59 = vld [vmem:[%s1714_s30 + $0xd0] sm:$0xff]  ;;  %v397_v60 = vld [vmem:[%s1714_s30 + $0xe8] sm:$0xff] }
  0x68   : > { %537 = vmatpush2.msra.mxu0 %v481_v9  ;;  %727 = vmatmul.mubr.f32.gmra.mxu1 %v1733_v18  ;;  %v396_v61 = vld [vmem:[%s1714_s30 + $0xe0] sm:$0xff]  ;;  %v399_v62 = vld [vmem:[%s1714_s30 + $0xf8] sm:$0xff]  ;;  %v398_v63 = vld [vmem:[%s1714_s30 + $0xf0] sm:$0xff] }
  0x69   : > { %538 = vmatprep.subr.mxu0 %v479_v11  ;;  %731 = vmatprep.mubr.f32.mxu1 %v373_v20  ;;  %v949_v4 = vld [vmem:[%s1933_s2] sm:$0x7] }
  0x6a   : > { %539 = vmatpush2.msra.mxu0 %v478_v13  ;;  %v1771_v7 = vrot.slane %v949_v4, %v961_v2 }
  0x6b   : > { %540 = vmatprep.subr.mxu0 %v476_v14 }
  0x6c   : > { %541 = vmatpush2.msra.mxu0 %v475_v16  ;;  %732 = vmatmul.mubr.f32.gmra.mxu1 %v372_v24 }
  0x6d   : > { %542 = vmatprep.subr.mxu0 %v473_v17  ;;  %736 = vmatprep.mubr.f32.mxu1 %v375_v26 }
  0x6e   : > { %543 = vmatpush2.msra.mxu0 %v472_v19 }
  0x6f   : > { %544 = vmatprep.subr.mxu0 %v470_v21 }
  0x70   : > { %545 = vmatpush2.msra.mxu0 %v469_v22  ;;  %737 = vmatmul.mubr.f32.gmra.mxu1 %v374_v30 }
  0x71   : > { %546 = vmatprep.subr.mxu0 %v467_v23  ;;  %741 = vmatprep.mubr.f32.mxu1 %v377_v32  ;;  %v953_v23 = vsub.s32 0, %v952_v1 }
  0x72   : > { %547 = vmatpush2.msra.mxu0 %v466_v25 }
  0x73   : > { %548 = vmatprep.subr.mxu0 %v464_v27 }
  0x74   : > { %549 = vmatpush2.msra.mxu0 %v463_v28  ;;  %742 = vmatmul.mubr.f32.gmra.mxu1 %v376_v36 }
  0x75   : > { %550 = vmatprep.subr.mxu0 %v461_v29  ;;  %746 = vmatprep.mubr.f32.mxu1 %v379_v38 }
  0x76   : > { %551 = vmatpush2.msra.mxu0 %v460_v31 }
  0x77   : > { %552 = vmatprep.subr.mxu0 %v458_v33 }
  0x78   : > { %553 = vmatpush2.msra.mxu0 %v457_v34  ;;  %747 = vmatmul.mubr.f32.gmra.mxu1 %v378_v42 }
  0x79   : > { %554 = vmatprep.subr.mxu0 %v455_v35  ;;  %751 = vmatprep.mubr.f32.mxu1 %v381_v44 }
  0x7a   : > { %555 = vmatpush2.msra.mxu0 %v454_v37 }
  0x7b   : > { %556 = vmatprep.subr.mxu0 %v452_v39 }
  0x7c   : > { %557 = vmatpush2.msra.mxu0 %v451_v40  ;;  %752 = vmatmul.mubr.f32.gmra.mxu1 %v380_v45 }
  0x7d   : > { %558 = vmatprep.subr.mxu0 %v449_v41  ;;  %756 = vmatprep.mubr.f32.mxu1 %v383_v46 }
  0x7e   : > { %559 = vmatpush2.msra.mxu0 %v448_v43 }
  0x7f   : > { %561 = vmatmul.mubr.f32.vlgmr.msra.gmra.mxu0 %v1726_v12 }
  0x80   : > { %566 = vmatprep.mubr.f32.mxu0 %v1729_v15  ;;  %757 = vmatmul.mubr.f32.gmra.mxu1 %v382_v47 }
  0x81   : > { %761 = vmatprep.mubr.f32.mxu1 %v385_v48 }
  0x83   : > { %567 = vmatmul.mubr.f32.gmra.mxu0 %v1733_v18 }
  0x84   : > { %572 = vmatprep.mubr.f32.mxu0 %v373_v20  ;;  %762 = vmatmul.mubr.f32.gmra.mxu1 %v384_v49 }
  0x85   : > { %766 = vmatprep.mubr.f32.mxu1 %v387_v50 }
  0x87   : > { %573 = vmatmul.mubr.f32.gmra.mxu0 %v372_v24 }
  0x88   : > { %578 = vmatprep.mubr.f32.mxu0 %v375_v26  ;;  %767 = vmatmul.mubr.f32.gmra.mxu1 %v386_v51  ;;  %v957_v26 = vsub.s32 1, %v952_v1 }
  0x89   : > { %771 = vmatprep.mubr.f32.mxu1 %v389_v52 }
  0x8a   : > { %v1785_v34 = vrot.slane %v949_v4, %v957_v26 }
  0x8b   : > { %579 = vmatmul.mubr.f32.gmra.mxu0 %v374_v30  ;;  %v1783_v30 = vrot.slane %v949_v4, %v953_v23 }
  0x8c   : > { %584 = vmatprep.mubr.f32.mxu0 %v377_v32  ;;  %772 = vmatmul.mubr.f32.gmra.mxu1 %v388_v53 }
  0x8d   : > { %776 = vmatprep.mubr.f32.mxu1 %v391_v54 }
  0x8f   : > { %585 = vmatmul.mubr.f32.gmra.mxu0 %v376_v36 }
  0x90   : > { %590 = vmatprep.mubr.f32.mxu0 %v379_v38  ;;  %777 = vmatmul.mubr.f32.gmra.mxu1 %v390_v55 }
  0x91   : > { %781 = vmatprep.mubr.f32.mxu1 %v393_v56 }
  0x93   : > { %591 = vmatmul.mubr.f32.gmra.mxu0 %v378_v42 }
  0x94   : > { %596 = vmatprep.mubr.f32.mxu0 %v381_v44  ;;  %782 = vmatmul.mubr.f32.gmra.mxu1 %v392_v57 }
  0x95   : > { %786 = vmatprep.mubr.f32.mxu1 %v395_v58 }
  0x97   : > { %597 = vmatmul.mubr.f32.gmra.mxu0 %v380_v45 }
  0x98   : > { %602 = vmatprep.mubr.f32.mxu0 %v383_v46  ;;  %787 = vmatmul.mubr.f32.gmra.mxu1 %v394_v59 }
  0x99   : > { %791 = vmatprep.mubr.f32.mxu1 %v397_v60 }
  0x9b   : > { %603 = vmatmul.mubr.f32.gmra.mxu0 %v382_v47 }
  0x9c   : > { %608 = vmatprep.mubr.f32.mxu0 %v385_v48  ;;  %792 = vmatmul.mubr.f32.gmra.mxu1 %v396_v61 }
  0x9d   : > { %796 = vmatprep.mubr.f32.mxu1 %v399_v62 }
  0x9f   : > { %609 = vmatmul.mubr.f32.gmra.mxu0 %v384_v49 }
  0xa0   : > { %614 = vmatprep.mubr.f32.mxu0 %v387_v50  ;;  %797 = vmatmul.mubr.f32.gmra.mxu1 %v398_v63 }
  0xa3   : > { %615 = vmatmul.mubr.f32.gmra.mxu0 %v386_v51 }
  0xa4   : > { %620 = vmatprep.mubr.f32.mxu0 %v389_v52 }
  0xa7   : > { %621 = vmatmul.mubr.f32.gmra.mxu0 %v388_v53 }
  0xa8   : > { %626 = vmatprep.mubr.f32.mxu0 %v391_v54 }
  0xab   : > { %627 = vmatmul.mubr.f32.gmra.mxu0 %v390_v55 }
  0xac   : > { %632 = vmatprep.mubr.f32.mxu0 %v393_v56 }
  0xaf   : > { %633 = vmatmul.mubr.f32.gmra.mxu0 %v392_v57 }
  0xb0   : > { %638 = vmatprep.mubr.f32.mxu0 %v395_v58 }
  0xb3   : > { %639 = vmatmul.mubr.f32.gmra.mxu0 %v394_v59 }
  0xb4   : > { %644 = vmatprep.mubr.f32.mxu0 %v397_v60 }
  0xb7   : > { %645 = vmatmul.mubr.f32.gmra.mxu0 %v396_v61 }
  0xb8   : > { %650 = vmatprep.mubr.f32.mxu0 %v399_v62 }
  0xbb   : > { %651 = vmatmul.mubr.f32.gmra.mxu0 %v398_v63 }
 0x124   : > { %v1296_v3 = vpop.f32.mrf.mxu1 }
 0x126   : > { %v1297_v5 = vpop.f32.mrf.mxu1 }
 0x127   : > { %v1298_v6 = vadd.f32 %v1297_v5, %v1296_v3 }
 0x128   : > { %v1299_v8 = vpop.f32.mrf.mxu1 }
 0x129   : > { %v968_v10 = vadd.f32 %v1298_v6, %v1771_v7 }
 0x12a   : > { %v1300_v9 = vpop.f32.mrf.mxu1 }
 0x12b   : > { %v1301_v11 = vadd.f32 %v1300_v9, %v1299_v8  ;;  %v1016_v13 = vmax.f32 %v968_v10, 0.0 }
 0x12c   : > { %v1302_v12 = vpop.f32.mrf.mxu1 }
 0x12d   : > { %1064 = vst [vmem:[%s1775_s29 + $0x10] sm:$0xff] %v1016_v13  ;;  %v971_v15 = vadd.f32 %v1301_v11, %v1771_v7 }
 0x12e   : > { %v1303_v14 = vpop.f32.mrf.mxu1 }
 0x12f   : > { %v1304_v16 = vadd.f32 %v1303_v14, %v1302_v12  ;;  %v1019_v18 = vmax.f32 %v971_v15, 0.0 }
 0x130   : > { %v1305_v17 = vpop.f32.mrf.mxu1 }
 0x131   : > { %1067 = vst [vmem:[%s1775_s29 + $0x28] sm:$0xff] %v1019_v18  ;;  %v974_v20 = vadd.f32 %v1304_v16, %v1771_v7 }
 0x132   : > { %v1306_v19 = vpop.f32.mrf.mxu1 }
 0x133   : > { %v1307_v21 = vadd.f32 %v1306_v19, %v1305_v17  ;;  %v1022_v24 = vmax.f32 %v974_v20, 0.0 }
 0x134   : > { %v1308_v22 = vpop.f32.mrf.mxu1 }
 0x135   : > { %1070 = vst [vmem:[%s1775_s29 + $0x40] sm:$0xff] %v1022_v24  ;;  %v977_v27 = vadd.f32 %v1307_v21, %v1771_v7 }
 0x136   : > { %v1309_v25 = vpop.f32.mrf.mxu1 }
 0x137   : > { %v1310_v28 = vadd.f32 %v1309_v25, %v1308_v22  ;;  %v1025_v31 = vmax.f32 %v977_v27, 0.0 }
 0x138   : > { %v1311_v29 = vpop.f32.mrf.mxu1 }
 0x139   : > { %1073 = vst [vmem:[%s1775_s29 + $0x58] sm:$0xff] %v1025_v31  ;;  %v980_v35 = vadd.f32 %v1310_v28, %v1771_v7 }
 0x13a   : > { %v1312_v33 = vpop.f32.mrf.mxu1 }
 0x13b   : > { %v1313_v36 = vadd.f32 %v1312_v33, %v1311_v29  ;;  %v1028_v40 = vmax.f32 %v980_v35, 0.0 }
 0x13c   : > { %v1314_v38 = vpop.f32.mrf.mxu1 }
 0x13d   : > { %1076 = vst [vmem:[%s1775_s29 + $0x70] sm:$0xff] %v1028_v40  ;;  %v983_v45 = vadd.f32 %v1313_v36, %v1771_v7 }
 0x13e   : > { %v1315_v42 = vpop.f32.mrf.mxu1 }
 0x13f   : > { %v562_v32 = vpop.f32.mrf.mxu0  ;;  %v1316_v47 = vadd.f32 %v1315_v42, %v1314_v38  ;;  %v1031_v51 = vmax.f32 %v983_v45, 0.0 }
 0x140   : > { %v966_v39 = vadd.f32 %v1783_v30, %v562_v32  ;;  %v1317_v48 = vpop.f32.mrf.mxu1 }
 0x141   : > { %v564_v37 = vpop.f32.mrf.mxu0  ;;  %1079 = vst [vmem:[%s1775_s29 + $0x88] sm:$0xff] %v1031_v51  ;;  %v986_v58 = vadd.f32 %v1316_v47, %v1771_v7 }
 0x142   : > { %v1014_v43 = vmax.f32 %v966_v39, 0.0  ;;  %v967_v44 = vadd.f32 %v1785_v34, %v564_v37  ;;  %v1318_v53 = vpop.f32.mrf.mxu1 }
 0x143   : > { %v568_v41 = vpop.f32.mrf.mxu0  ;;  %v1319_v56 = vadd.f32 %v1318_v53, %v1317_v48  ;;  %v1034_v63 = vmax.f32 %v986_v58, 0.0 }
 0x144   : > { %1062 = vst [vmem:[%s1775_s29] sm:$0xff] %v1014_v43  ;;  %v1015_v49 = vmax.f32 %v967_v44, 0.0  ;;  %v969_v50 = vadd.f32 %v1783_v30, %v568_v41  ;;  %v1320_v59 = vpop.f32.mrf.mxu1 }
 0x145   : > { %v570_v46 = vpop.f32.mrf.mxu0  ;;  %v989_v3 = vadd.f32 %v1319_v56, %v1771_v7  ;;  %1082 = vst [vmem:[%s1775_s29 + $0xa0] sm:$0xff] %v1034_v63 }
 0x146   : > { %1063 = vst [vmem:[%s1775_s29 + $0x8] sm:$0xff] %v1015_v49  ;;  %v1017_v54 = vmax.f32 %v969_v50, 0.0  ;;  %v970_v55 = vadd.f32 %v1785_v34, %v570_v46  ;;  %v1321_v0 = vpop.f32.mrf.mxu1 }
 0x147   : > { %v574_v52 = vpop.f32.mrf.mxu0  ;;  %v1322_v5 = vadd.f32 %v1321_v0, %v1320_v59  ;;  %v1037_v10 = vmax.f32 %v989_v3, 0.0 }
 0x148   : > { %1065 = vst [vmem:[%s1775_s29 + $0x18] sm:$0xff] %v1017_v54  ;;  %v1018_v60 = vmax.f32 %v970_v55, 0.0  ;;  %v972_v61 = vadd.f32 %v1783_v30, %v574_v52  ;;  %v1323_v6 = vpop.f32.mrf.mxu1 }
 0x149   : > { %v576_v57 = vpop.f32.mrf.mxu0  ;;  %1085 = vst [vmem:[%s1775_s29 + $0xb8] sm:$0xff] %v1037_v10  ;;  %v992_v17 = vadd.f32 %v1322_v5, %v1771_v7 }
 0x14a   : > { %1066 = vst [vmem:[%s1775_s29 + $0x20] sm:$0xff] %v1018_v60  ;;  %v1020_v1 = vmax.f32 %v972_v61, 0.0  ;;  %v973_v2 = vadd.f32 %v1785_v34, %v576_v57  ;;  %v1324_v12 = vpop.f32.mrf.mxu1 }
 0x14b   : > { %v580_v62 = vpop.f32.mrf.mxu0  ;;  %v1325_v15 = vadd.f32 %v1324_v12, %v1323_v6  ;;  %v1040_v22 = vmax.f32 %v992_v17, 0.0 }
 0x14c   : > { %1068 = vst [vmem:[%s1775_s29 + $0x30] sm:$0xff] %v1020_v1  ;;  %v1021_v8 = vmax.f32 %v973_v2, 0.0  ;;  %v975_v9 = vadd.f32 %v1783_v30, %v580_v62  ;;  %v1326_v18 = vpop.f32.mrf.mxu1 }
 0x14d   : > { %v582_v4 = vpop.f32.mrf.mxu0  ;;  %v995_v26 = vadd.f32 %v1325_v15, %v1771_v7  ;;  %1088 = vst [vmem:[%s1775_s29 + $0xd0] sm:$0xff] %v1040_v22 }
 0x14e   : > { %1069 = vst [vmem:[%s1775_s29 + $0x38] sm:$0xff] %v1021_v8  ;;  %v1023_v13 = vmax.f32 %v975_v9, 0.0  ;;  %v976_v14 = vadd.f32 %v1785_v34, %v582_v4  ;;  %v1327_v23 = vpop.f32.mrf.mxu1 }
 0x14f   : > { %v586_v11 = vpop.f32.mrf.mxu0  ;;  %v1328_v28 = vadd.f32 %v1327_v23, %v1326_v18  ;;  %v1043_v33 = vmax.f32 %v995_v26, 0.0 }
 0x150   : > { %1071 = vst [vmem:[%s1775_s29 + $0x48] sm:$0xff] %v1023_v13  ;;  %v1024_v19 = vmax.f32 %v976_v14, 0.0  ;;  %v978_v20 = vadd.f32 %v1783_v30, %v586_v11  ;;  %v1329_v29 = vpop.f32.mrf.mxu1 }
 0x151   : > { %v588_v16 = vpop.f32.mrf.mxu0  ;;  %1091 = vst [vmem:[%s1775_s29 + $0xe8] sm:$0xff] %v1043_v33  ;;  %v998_v41 = vadd.f32 %v1328_v28, %v1771_v7 }
 0x152   : > { %1072 = vst [vmem:[%s1775_s29 + $0x50] sm:$0xff] %v1024_v19  ;;  %v1026_v24 = vmax.f32 %v978_v20, 0.0  ;;  %v979_v25 = vadd.f32 %v1785_v34, %v588_v16  ;;  %v1330_v36 = vpop.f32.mrf.mxu1 }
 0x153   : > { %v592_v21 = vpop.f32.mrf.mxu0  ;;  %v1331_v39 = vadd.f32 %v1330_v36, %v1329_v29  ;;  %v1046_v46 = vmax.f32 %v998_v41, 0.0 }
 0x154   : > { %1074 = vst [vmem:[%s1775_s29 + $0x60] sm:$0xff] %v1026_v24  ;;  %v1027_v31 = vmax.f32 %v979_v25, 0.0  ;;  %v981_v32 = vadd.f32 %v1783_v30, %v592_v21  ;;  %v1332_v42 = vpop.f32.mrf.mxu1 }
 0x155   : > { %v594_v27 = vpop.f32.mrf.mxu0  ;;  %v1001_v50 = vadd.f32 %v1331_v39, %v1771_v7  ;;  %1094 = vst [vmem:[%s1775_s29 + $0x100] sm:$0xff] %v1046_v46 }
 0x156   : > { %1075 = vst [vmem:[%s1775_s29 + $0x68] sm:$0xff] %v1027_v31  ;;  %v1029_v37 = vmax.f32 %v981_v32, 0.0  ;;  %v982_v38 = vadd.f32 %v1785_v34, %v594_v27  ;;  %v1333_v47 = vpop.f32.mrf.mxu1 }
 0x157   : > { %v598_v35 = vpop.f32.mrf.mxu0  ;;  %v1334_v52 = vadd.f32 %v1333_v47, %v1332_v42  ;;  %v1049_v56 = vmax.f32 %v1001_v50, 0.0 }
 0x158   : > { %1077 = vst [vmem:[%s1775_s29 + $0x78] sm:$0xff] %v1029_v37  ;;  %v1030_v43 = vmax.f32 %v982_v38, 0.0  ;;  %v984_v44 = vadd.f32 %v1783_v30, %v598_v35  ;;  %v1335_v53 = vpop.f32.mrf.mxu1 }
 0x159   : > { %v600_v40 = vpop.f32.mrf.mxu0  ;;  %1097 = vst [vmem:[%s1775_s29 + $0x118] sm:$0xff] %v1049_v56  ;;  %v1004_v63 = vadd.f32 %v1334_v52, %v1771_v7 }
 0x15a   : > { %1078 = vst [vmem:[%s1775_s29 + $0x80] sm:$0xff] %v1030_v43  ;;  %v1032_v48 = vmax.f32 %v984_v44, 0.0  ;;  %v985_v49 = vadd.f32 %v1785_v34, %v600_v40  ;;  %v1336_v58 = vpop.f32.mrf.mxu1 }
 0x15b   : > { %v604_v45 = vpop.f32.mrf.mxu0  ;;  %v1337_v61 = vadd.f32 %v1336_v58, %v1335_v53  ;;  %v1052_v4 = vmax.f32 %v1004_v63, 0.0 }
 0x15c   : > { %1080 = vst [vmem:[%s1775_s29 + $0x90] sm:$0xff] %v1032_v48  ;;  %v1033_v54 = vmax.f32 %v985_v49, 0.0  ;;  %v987_v55 = vadd.f32 %v1783_v30, %v604_v45  ;;  %v1338_v0 = vpop.f32.mrf.mxu1 }
 0x15d   : > { %v606_v51 = vpop.f32.mrf.mxu0  ;;  %v1007_v9 = vadd.f32 %v1337_v61, %v1771_v7  ;;  %1100 = vst [vmem:[%s1775_s29 + $0x130] sm:$0xff] %v1052_v4 }
 0x15e   : > { %1081 = vst [vmem:[%s1775_s29 + $0x98] sm:$0xff] %v1033_v54  ;;  %v1035_v59 = vmax.f32 %v987_v55, 0.0  ;;  %v988_v60 = vadd.f32 %v1785_v34, %v606_v51  ;;  %v1339_v5 = vpop.f32.mrf.mxu1 }
 0x15f   : > { %v610_v57 = vpop.f32.mrf.mxu0  ;;  %v1340_v11 = vadd.f32 %v1339_v5, %v1338_v0  ;;  %v1055_v15 = vmax.f32 %v1007_v9, 0.0 }
 0x160   : > { %1083 = vst [vmem:[%s1775_s29 + $0xa8] sm:$0xff] %v1035_v59  ;;  %v1036_v1 = vmax.f32 %v988_v60, 0.0  ;;  %v990_v2 = vadd.f32 %v1783_v30, %v610_v57  ;;  %v1341_v12 = vpop.f32.mrf.mxu1 }
 0x161   : > { %v612_v62 = vpop.f32.mrf.mxu0  ;;  %1103 = vst [vmem:[%s1775_s29 + $0x148] sm:$0xff] %v1055_v15  ;;  %v1010_v22 = vadd.f32 %v1340_v11, %v1771_v7 }
 0x162   : > { %1084 = vst [vmem:[%s1775_s29 + $0xb0] sm:$0xff] %v1036_v1  ;;  %v1038_v6 = vmax.f32 %v990_v2, 0.0  ;;  %v991_v8 = vadd.f32 %v1785_v34, %v612_v62  ;;  %v1342_v17 = vpop.f32.mrf.mxu1 }
 0x163   : > { %v616_v3 = vpop.f32.mrf.mxu0  ;;  %v1343_v20 = vadd.f32 %v1342_v17, %v1341_v12  ;;  %v1058_v26 = vmax.f32 %v1010_v22, 0.0 }
 0x164   : > { %1086 = vst [vmem:[%s1775_s29 + $0xc0] sm:$0xff] %v1038_v6  ;;  %v1039_v13 = vmax.f32 %v991_v8, 0.0  ;;  %v993_v14 = vadd.f32 %v1783_v30, %v616_v3 }
 0x165   : > { %v618_v10 = vpop.f32.mrf.mxu0  ;;  %v1013_v29 = vadd.f32 %v1343_v20, %v1771_v7  ;;  %1106 = vst [vmem:[%s1775_s29 + $0x160] sm:$0xff] %v1058_v26 }
 0x166   : > { %1087 = vst [vmem:[%s1775_s29 + $0xc8] sm:$0xff] %v1039_v13  ;;  %v1041_v18 = vmax.f32 %v993_v14, 0.0  ;;  %v994_v19 = vadd.f32 %v1785_v34, %v618_v10 }
 0x167   : > { %v622_v16 = vpop.f32.mrf.mxu0  ;;  %v1061_v35 = vmax.f32 %v1013_v29, 0.0 }
 0x168   : > { %1089 = vst [vmem:[%s1775_s29 + $0xd8] sm:$0xff] %v1041_v18  ;;  %v1042_v23 = vmax.f32 %v994_v19, 0.0  ;;  %v996_v24 = vadd.f32 %v1783_v30, %v622_v16 }
 0x169   : > { %v624_v21 = vpop.f32.mrf.mxu0  ;;  %1109 = vst [vmem:[%s1775_s29 + $0x178] sm:$0xff] %v1061_v35 }
 0x16a   : > { %1090 = vst [vmem:[%s1775_s29 + $0xe0] sm:$0xff] %v1042_v23  ;;  %v1044_v27 = vmax.f32 %v996_v24, 0.0  ;;  %v997_v28 = vadd.f32 %v1785_v34, %v624_v21 }
 0x16b   : > { %v628_v25 = vpop.f32.mrf.mxu0 }
 0x16c   : > { %1092 = vst [vmem:[%s1775_s29 + $0xf0] sm:$0xff] %v1044_v27  ;;  %v1045_v32 = vmax.f32 %v997_v28, 0.0  ;;  %v999_v33 = vadd.f32 %v1783_v30, %v628_v25 }
 0x16d   : > { %v630_v31 = vpop.f32.mrf.mxu0 }
 0x16e   : > { %1093 = vst [vmem:[%s1775_s29 + $0xf8] sm:$0xff] %v1045_v32  ;;  %v1047_v37 = vmax.f32 %v999_v33, 0.0  ;;  %v1000_v38 = vadd.f32 %v1785_v34, %v630_v31 }
 0x16f   : > { %v634_v36 = vpop.f32.mrf.mxu0 }
 0x170   : > { %1095 = vst [vmem:[%s1775_s29 + $0x108] sm:$0xff] %v1047_v37  ;;  %v1048_v7 = vmax.f32 %v1000_v38, 0.0  ;;  %v1002_v40 = vadd.f32 %v1783_v30, %v634_v36 }
 0x171   : > { %v636_v39 = vpop.f32.mrf.mxu0 }
 0x172   : > { %1096 = vst [vmem:[%s1775_s29 + $0x110] sm:$0xff] %v1048_v7  ;;  %v1050_v42 = vmax.f32 %v1002_v40, 0.0  ;;  %v1003_v43 = vadd.f32 %v1785_v34, %v636_v39 }
 0x173   : > { %v640_v41 = vpop.f32.mrf.mxu0 }
 0x174   : > { %1098 = vst [vmem:[%s1775_s29 + $0x120] sm:$0xff] %v1050_v42  ;;  %v1051_v45 = vmax.f32 %v1003_v43, 0.0  ;;  %v1005_v46 = vadd.f32 %v1783_v30, %v640_v41 }
 0x175   : > { %v642_v44 = vpop.f32.mrf.mxu0 }
 0x176   : > { %1099 = vst [vmem:[%s1775_s29 + $0x128] sm:$0xff] %v1051_v45  ;;  %v1053_v48 = vmax.f32 %v1005_v46, 0.0  ;;  %v1006_v49 = vadd.f32 %v1785_v34, %v642_v44 }
 0x177   : > { %v646_v47 = vpop.f32.mrf.mxu0 }
 0x178   : > { %1101 = vst [vmem:[%s1775_s29 + $0x138] sm:$0xff] %v1053_v48  ;;  %v1054_v51 = vmax.f32 %v1006_v49, 0.0  ;;  %v1008_v52 = vadd.f32 %v1783_v30, %v646_v47 }
 0x179   : > { %v648_v50 = vpop.f32.mrf.mxu0 }
 0x17a   : > { %1102 = vst [vmem:[%s1775_s29 + $0x140] sm:$0xff] %v1054_v51  ;;  %v1056_v54 = vmax.f32 %v1008_v52, 0.0  ;;  %v1009_v55 = vadd.f32 %v1785_v34, %v648_v50 }
 0x17b   : > { %v652_v53 = vpop.f32.mrf.mxu0 }
 0x17c   : > { %1104 = vst [vmem:[%s1775_s29 + $0x150] sm:$0xff] %v1056_v54  ;;  %v1057_v57 = vmax.f32 %v1009_v55, 0.0  ;;  %v1011_v58 = vadd.f32 %v1783_v30, %v652_v53 }
 0x17d   : > { %v654_v56 = vpop.f32.mrf.mxu0 }
 0x17e   : > { %1105 = vst [vmem:[%s1775_s29 + $0x158] sm:$0xff] %v1057_v57  ;;  %v1059_v59 = vmax.f32 %v1011_v58, 0.0  ;;  %v1012_v60 = vadd.f32 %v1785_v34, %v654_v56 }
 0x180   : > { %1107 = vst [vmem:[%s1775_s29 + $0x168] sm:$0xff] %v1059_v59  ;;  %v1060_v61 = vmax.f32 %v1012_v60, 0.0 }
 0x182   : > { %1108 = vst [vmem:[%s1775_s29 + $0x170] sm:$0xff] %v1060_v61 }
 0x183   : > { %1493 = shalt.err (!%p1490_p5)
}
 0x184   : > { %s1494_s26 = scalar_lea.hbm %s1879_s7, 6144  ;;  %s1498_s20 = scalar_lea.hbm %s1934_s3, 12288 }
 0x185   : > { %p1495_p7 = scmp.ne.s32.totalorder %s1879_s7, %s1494_s26  ;;  %p1499_p9 = scmp.lt.s32.totalorder %s1879_s7, %s1934_s3 }
 0x186   : > { %p1500_p11 = scmp.lt.s32.totalorder %s1498_s20, %s1494_s26 }
 0x187   : > { %p1496_p6 = pnand %p1495_p7, %p1682_p13 }
 0x188   : > { %p1501_p12 = por %p1500_p11, %p1499_p9 }
 0x189   : > { %p1497_p4 = pneg %p1496_p6 }
 0x18b   : > { %p1502_p1 = pnand %p1501_p12, %p1497_p4 }
 0x18d   : > { %1505 = shalt.err (!%p1502_p1)
}
 0x18e   : > { %s1573_s29 = smov 384   ;;  %s1574_s4 = smov 24  }
 0x18f   : > { %1352 = dma.vmem_to_hbm [thread:$0]  (%p1682_p13), %s1881_s21, 6144, %s1879_s7, %s1111_s15, %s1573_s29, %s1573_s29, %s1574_s4  }
 0x190 PF: > { %s1142_s5 = sand.u32 1, %s1544_s12   ;;  %p1946_p8 = scmp.ne.s32.totalorder %s1939_s23, 0 }
 0x191   : > { %p1947_p10 = scmp.ge.s32.totalorder %s1564_s17, 2  ;;  %s1143_s6 = scalar_lea.sflag [#allocation4], %s1142_s5 }
 0x193   : > { %p1363_p0 = pnand %p1947_p10, %p1946_p8 }
 0x195   : > { %p1364_p2 = pneg %p1363_p0 }
 0x197   : > { %1539 = dma.done.wait (%p1364_p2), %s1143_s6, 6144  }
 0x198   : > { %1541 = vsyncadd (%p1364_p2), %s1143_s6, 4294961152  ;;  %s20_s17 = sadd.s32 1, %s1564_s17   ;;  %s1948_s12 = smov %s1548_s13 }
 0x199   : > { %p17_p3 = scmp.ge.s32.totalorder %s20_s17, 4   ;;  %s1949_s13 = smov %s1552_s14 }
 0x19a   : > { %s1950_s14 = smov %s1691_s19  ;;  %s1951_s15 = smov %s1560_s16 }
 0x19b   : > { %s1952_s16 = smov %s1954_s28  ;;  %19 = sbr.rel (!%p17_p3) target bundleno = 7 (0x7), region = 93 }
 0x1a0   :  { %1148 = vsyncpa [#allocation3], 1 }
 0x1a1   :  { %1150 = vsyncpa [#allocation3 + $0x1], 1 }
 0x1a2   :  { %1151 = vsyncpa [#allocation6], 1 }
 0x1a3   :  { %1152 = vsyncpa [#allocation4], 1 }
 0x1a4   :  { %1154 = vsyncpa [#allocation4 + $0x1], 1 }

</bundles_post_ra>
